<compile_context>
chip_gen: v6e
topology: v6e:2x2x1
jax: 0.10.0
libtpu: 0.0.40
codegen_flags: <defaults>
</compile_context>

<pallas_src>
import jax
import jax.numpy as jnp
import numpy as np
from jax import lax
from jax.experimental import pallas as pl
from jax.experimental.pallas import tpu as pltpu


# ----------------------------- config ---------------------------------------
HIDDEN_DIM = 32
NUM_HEADS = 4
HEAD_DIM = HIDDEN_DIM // NUM_HEADS
SEQ_LEN = 8
BATCH = 2

# KANLinear hyper-params (efficient-KAN defaults)
GRID_SIZE = 5
SPLINE_ORDER = 3
GRID_RANGE = (-1.0, 1.0)
NUM_BASIS = GRID_SIZE + SPLINE_ORDER            # basis functions per input feature


# ----------------------------- fused Pallas kernel ---------------------------
def mha_fused_kernel(x_ref, basis_ref, wb_ref, ws_ref, rot_ref, cos_ref,
                     sin_ref, ow_ref, ob_ref, o_ref):
    """Entire MHA forward for one batch element, resident in VMEM/vregs.

    x_ref:     (S, D)            input hidden states
    basis_ref: (S, D*NUM_BASIS)  shared B-spline basis expansion of x
    wb_ref:    (D, 3D)           fused, pre-transposed KAN base weights [Q|K|V]
    ws_ref:    (D*NB, 3D)        fused, pre-transposed KAN spline weights [Q|K|V]
    rot_ref:   (D, D)            signed block-diag perm: t @ rot == rotate_half(t) per head
    cos_ref:   (S, D)            per-head-tiled RoPE cos table
    sin_ref:   (S, D)            per-head-tiled RoPE sin table
    ow_ref:    (D, D)            pre-transposed output projection weight
    ob_ref:    (1, D)            output projection bias
    o_ref:     (S, D)            output
    """
    d = HIDDEN_DIM

    x = x_ref[...]
    base = x * jax.nn.sigmoid(x)                              # SiLU (VPU + EUP)

    # Fused Q/K/V KAN projection: one pair of MXU matmuls instead of six.
    # (1/sqrt(head_dim) is already folded into the Q columns of wb/ws.)
    qkv = jnp.dot(base, wb_ref[...], preferred_element_type=jnp.float32)
    qkv = qkv + jnp.dot(basis_ref[...], ws_ref[...],
                        preferred_element_type=jnp.float32)   # (S, 3D) f32

    q = qkv[:, 0 * d:1 * d]
    k = qkv[:, 1 * d:2 * d]
    v = qkv[:, 2 * d:3 * d]

    # RoPE for all heads at once: rotate-half is a signed block-diagonal
    # permutation applied as one tiny MXU matmul (no lane slice/concat surgery).
    rot = rot_ref[...]
    cos = cos_ref[...]
    sin = sin_ref[...]
    q = q * cos + jnp.dot(q, rot, preferred_element_type=jnp.float32) * sin
    k = k * cos + jnp.dot(k, rot, preferred_element_type=jnp.float32) * sin

    # Per-head scaled-dot-product attention (unrolled over the 4 tiny heads).
    outs = []
    for h in range(NUM_HEADS):
        lo = h * HEAD_DIM
        hi = lo + HEAD_DIM
        qh = q[:, lo:hi]
        kh = k[:, lo:hi]
        vh = v[:, lo:hi]
        # contract the head dims directly (no materialized k^T)
        s_h = lax.dot_general(qh, kh, (((1,), (1,)), ((), ())),
                              preferred_element_type=jnp.float32)   # (S, S)
        s_h = s_h - jnp.max(s_h, axis=-1, keepdims=True)
        p = jnp.exp(s_h)
        # exact reciprocal: approx=True's ~2^-12 error risks the 1e-4 check
        p = p * pl.reciprocal(jnp.sum(p, axis=-1, keepdims=True), approx=False)
        outs.append(jnp.dot(p, vh, preferred_element_type=jnp.float32))

    attn = jnp.concatenate(outs, axis=-1)                     # (S, D) lane-dense

    out = jnp.dot(attn, ow_ref[...], preferred_element_type=jnp.float32)
    out = out + ob_ref[...]
    o_ref[...] = out.astype(o_ref.dtype)


# ----------------------------- JAX glue --------------------------------------
def make_bspline_grid(in_features):
    h = (GRID_RANGE[1] - GRID_RANGE[0]) / GRID_SIZE
    g = (jnp.arange(-SPLINE_ORDER, GRID_SIZE + SPLINE_ORDER + 1, dtype=jnp.float32) * h
         + GRID_RANGE[0])
    return jnp.broadcast_to(g, (in_features, g.shape[0]))     # (in, G+2K+1)


def b_splines(x, grid):
    """Cox-de Boor recursion.  x: (..., in) -> (..., in, G+K). Elementwise glue."""
    x_ = x[..., None]
    bases = ((x_ >= grid[:, :-1]) & (x_ < grid[:, 1:])).astype(x.dtype)
    for k in range(1, SPLINE_ORDER + 1):
        left = (x_ - grid[:, : -(k + 1)]) / (grid[:, k:-1] - grid[:, : -(k + 1)])
        right = (grid[:, k + 1:] - x_) / (grid[:, k + 1:] - grid[:, 1:-k])
        bases = left * bases[..., :-1] + right * bases[..., 1:]
    return bases


def rope_tables_np(seq_len, head_dim):
    half = head_dim // 2
    inv_freq = 1.0 / (10000.0 ** (np.arange(half, dtype=np.float32) / half))
    pos = np.arange(seq_len, dtype=np.float32)
    freqs = pos[:, None] * inv_freq[None, :]
    emb = np.concatenate([freqs, freqs], axis=-1)             # (S, Dh)
    return np.cos(emb).astype(np.float32), np.sin(emb).astype(np.float32)


def rotate_half_matrix_np(num_heads, head_dim):
    """R such that (t @ R) == per-head rotate_half(t) for heads laid out contiguously."""
    d = num_heads * head_dim
    half = head_dim // 2
    rot = np.zeros((d, d), np.float32)
    for h in range(num_heads):
        for j in range(half):
            rot[h * head_dim + half + j, h * head_dim + j] = -1.0   # col j gets -t[half+j]
            rot[h * head_dim + j, h * head_dim + half + j] = 1.0    # col half+j gets +t[j]
    return rot


def prepare_fused_params(params):
    """Fuse + pre-transpose weights once, outside the hot path."""
    scale = 1.0 / (HEAD_DIM ** 0.5)
    wb = jnp.concatenate([params["q"]["base_weight"] * scale,
                          params["k"]["base_weight"],
                          params["v"]["base_weight"]], axis=0).T          # (D, 3D)
    ws = jnp.concatenate([params["q"]["spline_weight"] * scale,
                          params["k"]["spline_weight"],
                          params["v"]["spline_weight"]], axis=0).T        # (D*NB, 3D)
    return {
        "wb_qkv": wb,
        "ws_qkv": ws,
        "out_w_t": params["out_w"].T,                                     # (D, D)
        "out_b": params["out_b"],                                         # (1, D)
        "grid": params["q"]["grid"],   # identical B-spline grid for q/k/v layers
    }


@jax.jit
def multi_head_attention(x, fused):
    """x: (B, S, D) -> (B, S, D); one fused Pallas kernel, grid over batch."""
    b, s, d = x.shape

    # Shared B-spline basis expansion: computed ONCE for Q/K/V, fused by XLA.
    basis = b_splines(x, fused["grid"]).reshape(b, s, d * NUM_BASIS)

    # Compile-time constants baked into the program (numpy at trace time).
    cos_h, sin_h = rope_tables_np(s, HEAD_DIM)
    cos_full = jnp.asarray(np.tile(cos_h, (1, NUM_HEADS)))                # (S, D)
    sin_full = jnp.asarray(np.tile(sin_h, (1, NUM_HEADS)))                # (S, D)
    rot = jnp.asarray(rotate_half_matrix_np(NUM_HEADS, HEAD_DIM))         # (D, D)

    return pl.pallas_call(
        mha_fused_kernel,
        out_shape=jax.ShapeDtypeStruct((b, s, d), x.dtype),
        grid=(b,),
        in_specs=[
            pl.BlockSpec((None, s, d), lambda i: (i, 0, 0)),              # x
            pl.BlockSpec((None, s, d * NUM_BASIS), lambda i: (i, 0, 0)),  # basis
            pl.BlockSpec((d, 3 * d), lambda i: (0, 0)),                   # wb_qkv
            pl.BlockSpec((d * NUM_BASIS, 3 * d), lambda i: (0, 0)),       # ws_qkv
            pl.BlockSpec((d, d), lambda i: (0, 0)),                       # rot
            pl.BlockSpec((s, d), lambda i: (0, 0)),                       # cos
            pl.BlockSpec((s, d), lambda i: (0, 0)),                       # sin
            pl.BlockSpec((d, d), lambda i: (0, 0)),                       # out_w_t
            pl.BlockSpec((1, d), lambda i: (0, 0)),                       # out_b
        ],
        out_specs=pl.BlockSpec((None, s, d), lambda i: (i, 0, 0)),
        compiler_params=pltpu.CompilerParams(
            dimension_semantics=("parallel",)),   # batch across TCs on v7x
    )(x, basis, fused["wb_qkv"], fused["ws_qkv"], rot, cos_full, sin_full,
      fused["out_w_t"], fused["out_b"])


# ----------------------------- reference (pure JAX) ---------------------------
def reference_mha(x, params):
    b, s, d = x.shape
    x2d = x.reshape(b * s, d)

    def kan_ref(x2d, p):
        basis = b_splines(x2d, p["grid"]).reshape(x2d.shape[0], -1)
        base = x2d * jax.nn.sigmoid(x2d)
        return base @ p["base_weight"].T + basis @ p["spline_weight"].T

    q = kan_ref(x2d, params["q"]).reshape(b, s, NUM_HEADS, HEAD_DIM).transpose(0, 2, 1, 3)
    k = kan_ref(x2d, params["k"]).reshape(b, s, NUM_HEADS, HEAD_DIM).transpose(0, 2, 1, 3)
    v = kan_ref(x2d, params["v"]).reshape(b, s, NUM_HEADS, HEAD_DIM).transpose(0, 2, 1, 3)

    cos_h, sin_h = rope_tables_np(s, HEAD_DIM)
    cos = jnp.asarray(cos_h)
    sin = jnp.asarray(sin_h)
    half = HEAD_DIM // 2

    def rope(t):
        t1, t2 = t[..., :half], t[..., half:]
        return t * cos + jnp.concatenate([-t2, t1], axis=-1) * sin

    q, k = rope(q), rope(k)
    scores = jnp.einsum("bhqd,bhkd->bhqk", q, k) / (HEAD_DIM ** 0.5)
    probs = jax.nn.softmax(scores, axis=-1)
    out = jnp.einsum("bhqk,bhkd->bhqd", probs, v)
    out = out.transpose(0, 2, 1, 3).reshape(b * s, d)
    return (out @ params["out_w"].T + params["out_b"][0]).reshape(b, s, d)


# ----------------------------- param init ------------------------------------
def init_kan_params(key, in_f, out_f):
    k1, k2, k3 = jax.random.split(key, 3)
    base_w = jax.random.normal(k1, (out_f, in_f), jnp.float32) * 0.1
    spline_w = jax.random.normal(k2, (out_f, in_f, NUM_BASIS), jnp.float32) * 0.1
    scaler = jax.random.normal(k3, (out_f, in_f), jnp.float32) * 0.1 + 1.0
    scaled = (spline_w * scaler[..., None]).reshape(out_f, in_f * NUM_BASIS)
    return {"base_weight": base_w, "spline_weight": scaled,
            "grid": make_bspline_grid(in_f)}


def init_params(key):
    kq, kk, kv, kw, kb = jax.random.split(key, 5)
    return {
        "q": init_kan_params(kq, HIDDEN_DIM, HIDDEN_DIM),
        "k": init_kan_params(kk, HIDDEN_DIM, HIDDEN_DIM),
        "v": init_kan_params(kv, HIDDEN_DIM, HIDDEN_DIM),
        "out_w": jax.random.normal(kw, (HIDDEN_DIM, HIDDEN_DIM), jnp.float32) * 0.1,
        "out_b": jax.random.normal(kb, (1, HIDDEN_DIM), jnp.float32) * 0.1,
    }


# ----------------------------- main ------------------------------------------
if __name__ == "__main__":
    key = jax.random.PRNGKey(0)
    kx, kp = jax.random.split(key)
    x = jax.random.normal(kx, (BATCH, SEQ_LEN, HIDDEN_DIM), jnp.float32)
    params = init_params(kp)
    fused = prepare_fused_params(params)

    y = multi_head_attention(x, fused)
    y = jax.block_until_ready(y)

    y_ref = reference_mha(x, params)
    np.testing.assert_allclose(np.asarray(y), np.asarray(y_ref), rtol=1e-4, atol=1e-4)

    print("KERNEL_OK")
</pallas_src>

<mosaic_0001>
module attributes {stable_mosaic.version = 11 : i64} {
  func.func @mha_fused_kernel(%arg0: i32, %arg1: memref<1x8x32xf32, #tpu.memory_space<vmem>>, %arg2: memref<1x8x256xf32, #tpu.memory_space<vmem>>, %arg3: memref<32x96xf32, #tpu.memory_space<vmem>>, %arg4: memref<256x96xf32, #tpu.memory_space<vmem>>, %arg5: memref<32x32xf32, #tpu.memory_space<vmem>>, %arg6: memref<8x32xf32, #tpu.memory_space<vmem>>, %arg7: memref<8x32xf32, #tpu.memory_space<vmem>>, %arg8: memref<32x32xf32, #tpu.memory_space<vmem>>, %arg9: memref<1x32xf32, #tpu.memory_space<vmem>>, %arg10: memref<1x8x32xf32, #tpu.memory_space<vmem>>) attributes {dimension_semantics = [#tpu.dimension_semantics<parallel>], iteration_bounds = array<i64: 2>, scalar_prefetch = 0 : i64, scratch_operands = 0 : i64, tpu.core_type = #tpu.core_type<tc>, window_params = [{transform_indices = @transform_0, window_bounds = array<i64: 1, 8, 32>}, {transform_indices = @transform_1, window_bounds = array<i64: 1, 8, 256>}, {pipeline_mode = #tpu.pipeline_mode<synchronous>, transform_indices = @transform_2, window_bounds = array<i64: 32, 96>}, {pipeline_mode = #tpu.pipeline_mode<synchronous>, transform_indices = @transform_3, window_bounds = array<i64: 256, 96>}, {pipeline_mode = #tpu.pipeline_mode<synchronous>, transform_indices = @transform_4, window_bounds = array<i64: 32, 32>}, {pipeline_mode = #tpu.pipeline_mode<synchronous>, transform_indices = @transform_5, window_bounds = array<i64: 8, 32>}, {pipeline_mode = #tpu.pipeline_mode<synchronous>, transform_indices = @transform_6, window_bounds = array<i64: 8, 32>}, {pipeline_mode = #tpu.pipeline_mode<synchronous>, transform_indices = @transform_7, window_bounds = array<i64: 32, 32>}, {pipeline_mode = #tpu.pipeline_mode<synchronous>, transform_indices = @transform_8, window_bounds = array<i64: 1, 32>}, {transform_indices = @transform_9, window_bounds = array<i64: 1, 8, 32>}]} {
    %c0 = arith.constant 0 : index
    %c0_0 = arith.constant 0 : index
    %c0_1 = arith.constant 0 : index
    %0 = vector.load %arg1[%c0, %c0_0, %c0_1] : memref<1x8x32xf32, #tpu.memory_space<vmem>>, vector<1x8x32xf32>
    %1 = vector.shape_cast %0 : vector<1x8x32xf32> to vector<8x32xf32>
    %2 = arith.negf %1 : vector<8x32xf32>
    %3 = math.exp %2 : vector<8x32xf32>
    %cst = arith.constant 1.000000e+00 : f32
    %4 = vector.broadcast %cst : f32 to vector<8x32xf32>
    %5 = arith.addf %4, %3 : vector<8x32xf32>
    %6 = arith.divf %4, %5 : vector<8x32xf32>
    %7 = arith.mulf %1, %6 : vector<8x32xf32>
    %c0_2 = arith.constant 0 : index
    %c0_3 = arith.constant 0 : index
    %8 = vector.load %arg3[%c0_2, %c0_3] : memref<32x96xf32, #tpu.memory_space<vmem>>, vector<32x96xf32>
    %cst_4 = arith.constant dense<0.000000e+00> : vector<8x96xf32>
    %9 = tpu.matmul %7, %8, %cst_4 {dimension_numbers = #tpu.dot_dimension_numbers<[1], [0], [0], [1], [0, 0, 1, 1], [], []>} : vector<8x32xf32>, vector<32x96xf32>, vector<8x96xf32> -> vector<8x96xf32>
    %c0_5 = arith.constant 0 : index
    %c0_6 = arith.constant 0 : index
    %c0_7 = arith.constant 0 : index
    %10 = vector.load %arg2[%c0_5, %c0_6, %c0_7] : memref<1x8x256xf32, #tpu.memory_space<vmem>>, vector<1x8x256xf32>
    %11 = vector.shape_cast %10 : vector<1x8x256xf32> to vector<8x256xf32>
    %c0_8 = arith.constant 0 : index
    %c0_9 = arith.constant 0 : index
    %12 = vector.load %arg4[%c0_8, %c0_9] : memref<256x96xf32, #tpu.memory_space<vmem>>, vector<256x96xf32>
    %cst_10 = arith.constant dense<0.000000e+00> : vector<8x96xf32>
    %13 = tpu.matmul %11, %12, %cst_10 {dimension_numbers = #tpu.dot_dimension_numbers<[1], [0], [0], [1], [0, 0, 1, 1], [], []>} : vector<8x256xf32>, vector<256x96xf32>, vector<8x96xf32> -> vector<8x96xf32>
    %14 = arith.addf %9, %13 : vector<8x96xf32>
    %15 = vector.extract_strided_slice %14 {offsets = [0, 0], sizes = [8, 32], strides = [1, 1]} : vector<8x96xf32> to vector<8x32xf32>
    %16 = vector.extract_strided_slice %14 {offsets = [0, 32], sizes = [8, 32], strides = [1, 1]} : vector<8x96xf32> to vector<8x32xf32>
    %17 = vector.extract_strided_slice %14 {offsets = [0, 64], sizes = [8, 32], strides = [1, 1]} : vector<8x96xf32> to vector<8x32xf32>
    %c0_11 = arith.constant 0 : index
    %c0_12 = arith.constant 0 : index
    %18 = vector.load %arg5[%c0_11, %c0_12] : memref<32x32xf32, #tpu.memory_space<vmem>>, vector<32x32xf32>
    %c0_13 = arith.constant 0 : index
    %c0_14 = arith.constant 0 : index
    %19 = vector.load %arg6[%c0_13, %c0_14] : memref<8x32xf32, #tpu.memory_space<vmem>>, vector<8x32xf32>
    %c0_15 = arith.constant 0 : index
    %c0_16 = arith.constant 0 : index
    %20 = vector.load %arg7[%c0_15, %c0_16] : memref<8x32xf32, #tpu.memory_space<vmem>>, vector<8x32xf32>
    %21 = arith.mulf %15, %19 : vector<8x32xf32>
    %cst_17 = arith.constant dense<0.000000e+00> : vector<8x32xf32>
    %22 = tpu.matmul %15, %18, %cst_17 {dimension_numbers = #tpu.dot_dimension_numbers<[1], [0], [0], [1], [0, 0, 1, 1], [], []>} : vector<8x32xf32>, vector<32x32xf32>, vector<8x32xf32> -> vector<8x32xf32>
    %23 = arith.mulf %22, %20 : vector<8x32xf32>
    %24 = arith.addf %21, %23 : vector<8x32xf32>
    %25 = arith.mulf %16, %19 : vector<8x32xf32>
    %cst_18 = arith.constant dense<0.000000e+00> : vector<8x32xf32>
    %26 = tpu.matmul %16, %18, %cst_18 {dimension_numbers = #tpu.dot_dimension_numbers<[1], [0], [0], [1], [0, 0, 1, 1], [], []>} : vector<8x32xf32>, vector<32x32xf32>, vector<8x32xf32> -> vector<8x32xf32>
    %27 = arith.mulf %26, %20 : vector<8x32xf32>
    %28 = arith.addf %25, %27 : vector<8x32xf32>
    %29 = vector.extract_strided_slice %24 {offsets = [0, 0], sizes = [8, 8], strides = [1, 1]} : vector<8x32xf32> to vector<8x8xf32>
    %30 = vector.extract_strided_slice %28 {offsets = [0, 0], sizes = [8, 8], strides = [1, 1]} : vector<8x32xf32> to vector<8x8xf32>
    %31 = vector.extract_strided_slice %17 {offsets = [0, 0], sizes = [8, 8], strides = [1, 1]} : vector<8x32xf32> to vector<8x8xf32>
    %cst_19 = arith.constant dense<0.000000e+00> : vector<8x8xf32>
    %32 = tpu.matmul %29, %30, %cst_19 {dimension_numbers = #tpu.dot_dimension_numbers<[1], [1], [0], [0], [0, 0, 1, 0], [], []>} : vector<8x8xf32>, vector<8x8xf32>, vector<8x8xf32> -> vector<8x8xf32>
    %cst_20 = arith.constant dense<0xFF800000> : vector<8xf32>
    %33 = vector.multi_reduction <maximumf>, %32, %cst_20 [1] : vector<8x8xf32> to vector<8xf32>
    %34 = vector.shape_cast %33 : vector<8xf32> to vector<8x1xf32>
    %35 = vector.broadcast %34 : vector<8x1xf32> to vector<8x8xf32>
    %36 = arith.subf %32, %35 : vector<8x8xf32>
    %37 = math.exp %36 : vector<8x8xf32>
    %cst_21 = arith.constant dense<0.000000e+00> : vector<8xf32>
    %38 = vector.multi_reduction <add>, %37, %cst_21 [1] : vector<8x8xf32> to vector<8xf32>
    %39 = vector.shape_cast %38 : vector<8xf32> to vector<8x1xf32>
    %40 = tpu.reciprocal %39 : vector<8x1xf32> -> vector<8x1xf32>
    %41 = vector.broadcast %40 : vector<8x1xf32> to vector<8x8xf32>
    %42 = arith.mulf %37, %41 : vector<8x8xf32>
    %cst_22 = arith.constant dense<0.000000e+00> : vector<8x8xf32>
    %43 = tpu.matmul %42, %31, %cst_22 {dimension_numbers = #tpu.dot_dimension_numbers<[1], [0], [0], [1], [0, 0, 1, 1], [], []>} : vector<8x8xf32>, vector<8x8xf32>, vector<8x8xf32> -> vector<8x8xf32>
    %44 = vector.extract_strided_slice %24 {offsets = [0, 8], sizes = [8, 8], strides = [1, 1]} : vector<8x32xf32> to vector<8x8xf32>
    %45 = vector.extract_strided_slice %28 {offsets = [0, 8], sizes = [8, 8], strides = [1, 1]} : vector<8x32xf32> to vector<8x8xf32>
    %46 = vector.extract_strided_slice %17 {offsets = [0, 8], sizes = [8, 8], strides = [1, 1]} : vector<8x32xf32> to vector<8x8xf32>
    %cst_23 = arith.constant dense<0.000000e+00> : vector<8x8xf32>
    %47 = tpu.matmul %44, %45, %cst_23 {dimension_numbers = #tpu.dot_dimension_numbers<[1], [1], [0], [0], [0, 0, 1, 0], [], []>} : vector<8x8xf32>, vector<8x8xf32>, vector<8x8xf32> -> vector<8x8xf32>
    %cst_24 = arith.constant dense<0xFF800000> : vector<8xf32>
    %48 = vector.multi_reduction <maximumf>, %47, %cst_24 [1] : vector<8x8xf32> to vector<8xf32>
    %49 = vector.shape_cast %48 : vector<8xf32> to vector<8x1xf32>
    %50 = vector.broadcast %49 : vector<8x1xf32> to vector<8x8xf32>
    %51 = arith.subf %47, %50 : vector<8x8xf32>
    %52 = math.exp %51 : vector<8x8xf32>
    %cst_25 = arith.constant dense<0.000000e+00> : vector<8xf32>
    %53 = vector.multi_reduction <add>, %52, %cst_25 [1] : vector<8x8xf32> to vector<8xf32>
    %54 = vector.shape_cast %53 : vector<8xf32> to vector<8x1xf32>
    %55 = tpu.reciprocal %54 : vector<8x1xf32> -> vector<8x1xf32>
    %56 = vector.broadcast %55 : vector<8x1xf32> to vector<8x8xf32>
    %57 = arith.mulf %52, %56 : vector<8x8xf32>
    %cst_26 = arith.constant dense<0.000000e+00> : vector<8x8xf32>
    %58 = tpu.matmul %57, %46, %cst_26 {dimension_numbers = #tpu.dot_dimension_numbers<[1], [0], [0], [1], [0, 0, 1, 1], [], []>} : vector<8x8xf32>, vector<8x8xf32>, vector<8x8xf32> -> vector<8x8xf32>
    %59 = vector.extract_strided_slice %24 {offsets = [0, 16], sizes = [8, 8], strides = [1, 1]} : vector<8x32xf32> to vector<8x8xf32>
    %60 = vector.extract_strided_slice %28 {offsets = [0, 16], sizes = [8, 8], strides = [1, 1]} : vector<8x32xf32> to vector<8x8xf32>
    %61 = vector.extract_strided_slice %17 {offsets = [0, 16], sizes = [8, 8], strides = [1, 1]} : vector<8x32xf32> to vector<8x8xf32>
    %cst_27 = arith.constant dense<0.000000e+00> : vector<8x8xf32>
    %62 = tpu.matmul %59, %60, %cst_27 {dimension_numbers = #tpu.dot_dimension_numbers<[1], [1], [0], [0], [0, 0, 1, 0], [], []>} : vector<8x8xf32>, vector<8x8xf32>, vector<8x8xf32> -> vector<8x8xf32>
    %cst_28 = arith.constant dense<0xFF800000> : vector<8xf32>
    %63 = vector.multi_reduction <maximumf>, %62, %cst_28 [1] : vector<8x8xf32> to vector<8xf32>
    %64 = vector.shape_cast %63 : vector<8xf32> to vector<8x1xf32>
    %65 = vector.broadcast %64 : vector<8x1xf32> to vector<8x8xf32>
    %66 = arith.subf %62, %65 : vector<8x8xf32>
    %67 = math.exp %66 : vector<8x8xf32>
    %cst_29 = arith.constant dense<0.000000e+00> : vector<8xf32>
    %68 = vector.multi_reduction <add>, %67, %cst_29 [1] : vector<8x8xf32> to vector<8xf32>
    %69 = vector.shape_cast %68 : vector<8xf32> to vector<8x1xf32>
    %70 = tpu.reciprocal %69 : vector<8x1xf32> -> vector<8x1xf32>
    %71 = vector.broadcast %70 : vector<8x1xf32> to vector<8x8xf32>
    %72 = arith.mulf %67, %71 : vector<8x8xf32>
    %cst_30 = arith.constant dense<0.000000e+00> : vector<8x8xf32>
    %73 = tpu.matmul %72, %61, %cst_30 {dimension_numbers = #tpu.dot_dimension_numbers<[1], [0], [0], [1], [0, 0, 1, 1], [], []>} : vector<8x8xf32>, vector<8x8xf32>, vector<8x8xf32> -> vector<8x8xf32>
    %74 = vector.extract_strided_slice %24 {offsets = [0, 24], sizes = [8, 8], strides = [1, 1]} : vector<8x32xf32> to vector<8x8xf32>
    %75 = vector.extract_strided_slice %28 {offsets = [0, 24], sizes = [8, 8], strides = [1, 1]} : vector<8x32xf32> to vector<8x8xf32>
    %76 = vector.extract_strided_slice %17 {offsets = [0, 24], sizes = [8, 8], strides = [1, 1]} : vector<8x32xf32> to vector<8x8xf32>
    %cst_31 = arith.constant dense<0.000000e+00> : vector<8x8xf32>
    %77 = tpu.matmul %74, %75, %cst_31 {dimension_numbers = #tpu.dot_dimension_numbers<[1], [1], [0], [0], [0, 0, 1, 0], [], []>} : vector<8x8xf32>, vector<8x8xf32>, vector<8x8xf32> -> vector<8x8xf32>
    %cst_32 = arith.constant dense<0xFF800000> : vector<8xf32>
    %78 = vector.multi_reduction <maximumf>, %77, %cst_32 [1] : vector<8x8xf32> to vector<8xf32>
    %79 = vector.shape_cast %78 : vector<8xf32> to vector<8x1xf32>
    %80 = vector.broadcast %79 : vector<8x1xf32> to vector<8x8xf32>
    %81 = arith.subf %77, %80 : vector<8x8xf32>
    %82 = math.exp %81 : vector<8x8xf32>
    %cst_33 = arith.constant dense<0.000000e+00> : vector<8xf32>
    %83 = vector.multi_reduction <add>, %82, %cst_33 [1] : vector<8x8xf32> to vector<8xf32>
    %84 = vector.shape_cast %83 : vector<8xf32> to vector<8x1xf32>
    %85 = tpu.reciprocal %84 : vector<8x1xf32> -> vector<8x1xf32>
    %86 = vector.broadcast %85 : vector<8x1xf32> to vector<8x8xf32>
    %87 = arith.mulf %82, %86 : vector<8x8xf32>
    %cst_34 = arith.constant dense<0.000000e+00> : vector<8x8xf32>
    %88 = tpu.matmul %87, %76, %cst_34 {dimension_numbers = #tpu.dot_dimension_numbers<[1], [0], [0], [1], [0, 0, 1, 1], [], []>} : vector<8x8xf32>, vector<8x8xf32>, vector<8x8xf32> -> vector<8x8xf32>
    %89 = tpu.concatenate %43, %58, %73, %88 in 1 : vector<8x8xf32>, vector<8x8xf32>, vector<8x8xf32>, vector<8x8xf32> -> vector<8x32xf32>
    %c0_35 = arith.constant 0 : index
    %c0_36 = arith.constant 0 : index
    %90 = vector.load %arg8[%c0_35, %c0_36] : memref<32x32xf32, #tpu.memory_space<vmem>>, vector<32x32xf32>
    %cst_37 = arith.constant dense<0.000000e+00> : vector<8x32xf32>
    %91 = tpu.matmul %89, %90, %cst_37 {dimension_numbers = #tpu.dot_dimension_numbers<[1], [0], [0], [1], [0, 0, 1, 1], [], []>} : vector<8x32xf32>, vector<32x32xf32>, vector<8x32xf32> -> vector<8x32xf32>
    %c0_38 = arith.constant 0 : index
    %c0_39 = arith.constant 0 : index
    %92 = vector.load %arg9[%c0_38, %c0_39] : memref<1x32xf32, #tpu.memory_space<vmem>>, vector<1x32xf32>
    %93 = vector.broadcast %92 : vector<1x32xf32> to vector<8x32xf32>
    %94 = arith.addf %91, %93 : vector<8x32xf32>
    %c0_40 = arith.constant 0 : index
    %c0_41 = arith.constant 0 : index
    %c0_42 = arith.constant 0 : index
    %95 = vector.load %arg10[%c0_40, %c0_41, %c0_42] : memref<1x8x32xf32, #tpu.memory_space<vmem>>, vector<1x8x32xf32>
    %96 = vector.shape_cast %95 : vector<1x8x32xf32> to vector<8x32xf32>
    %97 = vector.shape_cast %94 : vector<8x32xf32> to vector<1x8x32xf32>
    tpu.vector_store %arg10[%c0_40, %c0_41, %c0_42], %97 {strides = array<i32>} : memref<1x8x32xf32, #tpu.memory_space<vmem>>, vector<1x8x32xf32>,
    return
  }
  func.func @transform_0(%arg0: i32) -> (i32, i32, i32) {
    %c0_i32 = arith.constant 0 : i32
    %c0_i32_0 = arith.constant 0 : i32
    %c0_i32_1 = arith.constant 0 : i32
    return %arg0, %c0_i32, %c0_i32_0 : i32, i32, i32
  }
  func.func @transform_1(%arg0: i32) -> (i32, i32, i32) {
    %c0_i32 = arith.constant 0 : i32
    %c0_i32_0 = arith.constant 0 : i32
    %c0_i32_1 = arith.constant 0 : i32
    return %arg0, %c0_i32, %c0_i32_0 : i32, i32, i32
  }
  func.func @transform_2(%arg0: i32) -> (i32, i32) {
    %c0_i32 = arith.constant 0 : i32
    %c0_i32_0 = arith.constant 0 : i32
    %c0_i32_1 = arith.constant 0 : i32
    return %c0_i32, %c0_i32_0 : i32, i32
  }
  func.func @transform_3(%arg0: i32) -> (i32, i32) {
    %c0_i32 = arith.constant 0 : i32
    %c0_i32_0 = arith.constant 0 : i32
    %c0_i32_1 = arith.constant 0 : i32
    return %c0_i32, %c0_i32_0 : i32, i32
  }
  func.func @transform_4(%arg0: i32) -> (i32, i32) {
    %c0_i32 = arith.constant 0 : i32
    %c0_i32_0 = arith.constant 0 : i32
    %c0_i32_1 = arith.constant 0 : i32
    return %c0_i32, %c0_i32_0 : i32, i32
  }
  func.func @transform_5(%arg0: i32) -> (i32, i32) {
    %c0_i32 = arith.constant 0 : i32
    %c0_i32_0 = arith.constant 0 : i32
    %c0_i32_1 = arith.constant 0 : i32
    return %c0_i32, %c0_i32_0 : i32, i32
  }
  func.func @transform_6(%arg0: i32) -> (i32, i32) {
    %c0_i32 = arith.constant 0 : i32
    %c0_i32_0 = arith.constant 0 : i32
    %c0_i32_1 = arith.constant 0 : i32
    return %c0_i32, %c0_i32_0 : i32, i32
  }
  func.func @transform_7(%arg0: i32) -> (i32, i32) {
    %c0_i32 = arith.constant 0 : i32
    %c0_i32_0 = arith.constant 0 : i32
    %c0_i32_1 = arith.constant 0 : i32
    return %c0_i32, %c0_i32_0 : i32, i32
  }
  func.func @transform_8(%arg0: i32) -> (i32, i32) {
    %c0_i32 = arith.constant 0 : i32
    %c0_i32_0 = arith.constant 0 : i32
    %c0_i32_1 = arith.constant 0 : i32
    return %c0_i32, %c0_i32_0 : i32, i32
  }
  func.func @transform_9(%arg0: i32) -> (i32, i32, i32) {
    %c0_i32 = arith.constant 0 : i32
    %c0_i32_0 = arith.constant 0 : i32
    %c0_i32_1 = arith.constant 0 : i32
    return %arg0, %c0_i32, %c0_i32_0 : i32, i32, i32
  }
}

</mosaic_0001>

<bundles_post_ra>
// kernel: multi_head_attention.1
= control target key start
LH: loop header
LB: loop body
LE: loop exit
PB: predicated region body
PF: predicated region fallthrough
CT: control target
= control target key end

     0   :  { %14 = vsyncpa [#allocation3], 0  ;;  %s2279_s0 = inlined_call_operand.vmem [shape: f32[2,8,32], index: 0, kind: input, shape index: {}]   ;;  %s2280_s1 = inlined_call_operand.vmem [shape: f32[2,8,256], index: 1, kind: input, shape index: {}]   ;;  %s2281_s2 = inlined_call_operand.vmem [shape: f32[32,96], index: 2, kind: input, shape index: {}]   ;;  %s2282_s3 = inlined_call_operand.vmem [shape: f32[256,96], index: 3, kind: input, shape index: {}]   ;;  %s2283_s4 = inlined_call_operand.vmem [shape: f32[32,32], index: 4, kind: input, shape index: {}]   ;;  %s2284_s5 = inlined_call_operand.vmem [shape: f32[8,32], index: 5, kind: input, shape index: {}]   ;;  %s2285_s6 = inlined_call_operand.vmem [shape: f32[8,32], index: 6, kind: input, shape index: {}]   ;;  %s2286_s7 = inlined_call_operand.vmem [shape: f32[32,32], index: 7, kind: input, shape index: {}]   ;;  %s2287_s8 = inlined_call_operand.vmem [shape: f32[1,32], index: 8, kind: input, shape index: {}]   ;;  %s2288_s9 = inlined_call_operand.hbm [shape: f32[2,8,32], index: 9, kind: output, shape index: {}]  }
   0x1   :  { %16 = vsyncpa [#allocation3 + $0x1], 0  ;;  %s1945_s30 = smov 0   ;;  %s1947_s10 = smov 0  }
   0x2   :  { %s1949_s11 = smov 0   ;;  %s1951_s12 = smov 0  }
   0x3 LB: > { %2290 = sst [smem:[#allocation5_spill]] %s1871_s11  ;;  %s1966_s13 = sadd.s32 4294967295, %s1875_s12   ;;  %s1875_s12 = sphi %s1951_s12, %s2298_s12   ;;  %s1871_s11 = sphi %s1949_s11, %s2295_s11   ;;  %s1867_s10 = sphi %s1947_s10, %s2297_s10   ;;  %s1863_s30 = sphi %s1945_s30, %s2296_s30  }
   0x4   : > { %s1553_s14 = sadd.s32 4294967294, %s1875_s12   ;;  %s1970_s15 = sadd.s32 1, %s1875_s12  }
   0x5   : > { %s228_s16 = sadd.s32 1, %s1871_s11  ;;  %s225_s17 = ssub.s32 %s1875_s12, %s1970_s15 }
   0x6   : > { %p238_p0 = scmp.ne.s32.totalorder %s1871_s11, %s1867_s10  ;;  %p226_p1 = scmp.eq.s32.totalorder %s225_s17, 0 }
   0x7   : > { %p239_p2 = scmp.eq.s32.totalorder %s1966_s13, 1  ;;  %p244_p3 = scmp.ne.s32.totalorder %s1867_s10, %s1863_s30 }
   0x8   : > { %p245_p4 = scmp.eq.s32.totalorder %s1553_s14, 1  ;;  %p1556_p7 = scmp.ge.s32.totalorder %s1875_s12, 1 }
   0x9   : > { %s1981_s18 = scalar_select %p226_p1, %s1871_s11, %s228_s16  }
   0xa   : > { %p1983_p5 = por %p239_p2, %p238_p0  ;;  %p1987_p6 = por %p245_p4, %p244_p3 }
   0xb   : > { %2291 = sst [smem:[#allocation6_spill]] %s1981_s18  ;;  %p299_p8 = scmp.lt.s32.totalorder %s1875_s12, 3 }
   0xd   : > { %p300_p9 = pnand %p1556_p7, %p299_p8 }
   0xe   : > { %p339_p10 = scmp.lt.s32.totalorder (!%p300_p9), %s1966_s13, 1  ;;  %s1879_s18 = smov (!%p300_p9), 96  }
   0xf   : > { %303 = sbr.rel (%p300_p9) target bundleno = 2382 (0x94e), region = 56  ;;  %s1880_s21 = smov (!%p300_p9), 32  }
  0x10   : > { %s1882_s25 = smov (!%p300_p9), 64   ;;  %s1884_s28 = smov (!%p300_p9), 112  }
  0x11   : > { %s1885_s29 = smov (!%p300_p9), 104   ;;  %s1886_s14 = smov (!%p300_p9), 80  }
  0x12   : > { %s1887_s17 = smov (!%p300_p9), 72   ;;  %s1888_s11 = smov (!%p300_p9), 48  }
  0x14   : > { %v393_v0 = vld [vmem:[%s2282_s3 + $0xf8] sm:$0xff]  ;;  %v392_v2 = vld [vmem:[%s2282_s3 + $0xf0] sm:$0xff]  ;;  %v1877_v4 = vmov 0.0   ;;  %v391_v5 = vld [vmem:[%s2282_s3 + $0xe8] sm:$0xff]  ;;  %s340_s16 = scalar_select %p339_p10, %s1966_s13, 1  ;;  %vm1878_vm0 = vmmov 0  }
  0x15   : > { %v377_v1 = vld [vmem:[%s2282_s3 + $0x78] sm:$0xff]  ;;  %1584 = vmatprep.subr.mxu0 %v393_v0  ;;  %v376_v3 = vld [vmem:[%s2282_s3 + $0x70] sm:$0xff]  ;;  %1655 = vmatprep.subr.mxu1 %v1877_v4  ;;  %v375_v6 = vld [vmem:[%s2282_s3 + $0x68] sm:$0xff]  ;;  %vm464_vm1 = vcmask 261120   ;;  %vm708_vm2 = vcmask 64512   ;;  %vm1379_vm3 = vcmask 130048  }
  0x16   : > { %1585 = vmatpush3.msra.mxu0 %v377_v1  ;;  %1663 = vmatprep.mubr.msk.f32.mxu1 %vm1878_vm0, %v1877_v4  ;;  %v390_v7 = vld [vmem:[%s2282_s3 + $0xe0] sm:$0xff]  ;;  %s1558_s24 = sshll.u32 %s340_s16, 3  ;;  %s1583_s27 = sshll.u32 %s340_s16, 4  ;;  %v389_v9 = vld [vmem:[%s2282_s3 + $0xd8] sm:$0xff]  ;;  %v388_v11 = vld [vmem:[%s2282_s3 + $0xd0] sm:$0xff]  ;;  %vm1381_vm4 = vcmask 195584  }
  0x17   : > { %1586 = vmatprep.subr.mxu0 %v392_v2  ;;  %v374_v8 = vld [vmem:[%s2282_s3 + $0x60] sm:$0xff]  ;;  %v373_v10 = vld [vmem:[%s2282_s3 + $0x58] sm:$0xff]  ;;  %s342_s23 = scalar_lea.vmem %s2279_s0, %s1558_s24  ;;  %s2037_s26 = scalar_lea.vmem %s2280_s1, %s1583_s27  ;;  %v372_v12 = vld [vmem:[%s2282_s3 + $0x50] sm:$0xff] }
  0x18   : > { %1587 = vmatpush3.msra.mxu0 %v376_v3  ;;  %v387_v13 = vld [vmem:[%s2282_s3 + $0xc8] sm:$0xff]  ;;  %v2045_v14 = vld [vmem:[%s342_s23] sm:$0xff]  ;;  %v359_v18 = vld [vmem:[%s2281_s2 + $0x18] sm:$0xff]  ;;  %s1881_s16 = smov 88   ;;  %s1890_s24 = smov 40  }
  0x19   : > { %1588 = vmatprep.subr.mxu0 %v391_v5  ;;  %v371_v15 = vld [vmem:[%s2282_s3 + $0x48] sm:$0xff]  ;;  %v1561_v16 = vmul.f32 -1.442695, %v2045_v14  ;;  %v386_v19 = vld [vmem:[%s2282_s3 + $0xc0] sm:$0xff]  ;;  %v358_v20 = vld [vmem:[%s2281_s2 + $0x10] sm:$0xff]  ;;  %1656 = vmatpush3.msra.mxu1 %v359_v18 }
  0x1a   : > { %1589 = vmatpush3.msra.mxu0 %v375_v6  ;;  %v361_v17 = vld [vmem:[%s2037_s26 + $0x8] sm:$0xff]  ;;  %v370_v21 = vld [vmem:[%s2282_s3 + $0x40] sm:$0xff]  ;;  %v385_v22 = vld [vmem:[%s2282_s3 + $0xb8] sm:$0xff]  ;;  %1657 = vmatprep.subr.mxu1 %v1877_v4 }
  0x1b   : > { %1590 = vmatprep.subr.mxu0 %v390_v7  ;;  %458 = vmatprep.mubr.f32.mxu0 %v361_v17  ;;  %1795 = vpow2.f32 %v1561_v16  ;;  %v357_v23 = vld [vmem:[%s2281_s2 + $0x8] sm:$0xff]  ;;  %v369_v24 = vld [vmem:[%s2282_s3 + $0x38] sm:$0xff]  ;;  %v384_v25 = vld [vmem:[%s2282_s3 + $0xb0] sm:$0xff] }
  0x1c   : > { %1591 = vmatpush3.msra.mxu0 %v374_v8  ;;  %1658 = vmatpush3.msra.mxu1 %v358_v20  ;;  %v356_v26 = vld [vmem:[%s2281_s2] sm:$0xff]  ;;  %v368_v27 = vld [vmem:[%s2282_s3 + $0x30] sm:$0xff]  ;;  %v383_v28 = vld [vmem:[%s2282_s3 + $0xa8] sm:$0xff] }
  0x1d   : > { %1592 = vmatprep.subr.mxu0 %v389_v9  ;;  %1659 = vmatprep.subr.mxu1 %v1877_v4  ;;  %v367_v29 = vld [vmem:[%s2282_s3 + $0x28] sm:$0xff]  ;;  %v382_v30 = vld [vmem:[%s2282_s3 + $0xa0] sm:$0xff]  ;;  %v381_v32 = vld [vmem:[%s2282_s3 + $0x98] sm:$0xff] }
  0x1e   : > { %1593 = vmatpush3.msra.mxu0 %v373_v10  ;;  %1660 = vmatpush3.msra.mxu1 %v357_v23  ;;  %v366_v31 = vld [vmem:[%s2282_s3 + $0x20] sm:$0xff]  ;;  %v365_v33 = vld [vmem:[%s2282_s3 + $0x18] sm:$0xff]  ;;  %v380_v34 = vld [vmem:[%s2282_s3 + $0x90] sm:$0xff] }
  0x1f   : > { %1594 = vmatprep.subr.mxu0 %v388_v11  ;;  %1661 = vmatprep.subr.mxu1 %v1877_v4  ;;  %v364_v35 = vld [vmem:[%s2282_s3 + $0x10] sm:$0xff]  ;;  %v379_v37 = vld [vmem:[%s2282_s3 + $0x88] sm:$0xff]  ;;  %v378_v40 = vld [vmem:[%s2282_s3 + $0x80] sm:$0xff] }
  0x20   : > { %1595 = vmatpush3.msra.mxu0 %v372_v12  ;;  %1662 = vmatpush3.msra.mxu1 %v356_v26  ;;  %v363_v38 = vld [vmem:[%s2282_s3 + $0x8] sm:$0xff]  ;;  %v362_v41 = vld [vmem:[%s2282_s3] sm:$0xff]  ;;  %v541_v45 = vld [vmem:[%s2283_s4 + $0x18] sm:$0xff] }
  0x21   : > { %1596 = vmatprep.subr.mxu0 %v387_v13  ;;  %1666 = vmatprep.subr.mxu1 %v1877_v4  ;;  %v360_v42 = vld [vmem:[%s2037_s26] sm:$0xff]  ;;  %v540_v46 = vld [vmem:[%s2283_s4 + $0x10] sm:$0xff]  ;;  %v539_v47 = vld [vmem:[%s2283_s4 + $0x8] sm:$0xff]  ;;  %s1883_s26 = smov 120  }
  0x22   : > { %1597 = vmatpush3.msra.mxu0 %v371_v15  ;;  %v538_v48 = vld [vmem:[%s2283_s4] sm:$0xff] }
  0x23   : > { %1598 = vmatprep.subr.mxu0 %v386_v19  ;;  %v542_v55 = vld [vmem:[%s2284_s5] sm:$0xff] }
  0x24   : > { %1599 = vmatpush3.msra.mxu0 %v370_v21  ;;  %v543_v57 = vld [vmem:[%s2285_s6] sm:$0xff] }
  0x25   : > { %1600 = vmatprep.subr.mxu0 %v385_v22 }
  0x26   : > { %1601 = vmatpush3.msra.mxu0 %v369_v24 }
  0x27   : > { %1602 = vmatprep.subr.mxu0 %v384_v25 }
  0x28   : > { %1603 = vmatpush3.msra.mxu0 %v368_v27  ;;  %v1796_v36 = vpop.eup %1795 }
  0x29   : > { %1604 = vmatprep.subr.mxu0 %v383_v28  ;;  %v352_v39 = vadd.f32 1.0, %v1796_v36 }
  0x2a   : > { %1605 = vmatpush3.msra.mxu0 %v367_v29 }
  0x2b   : > { %1606 = vmatprep.subr.mxu0 %v382_v30  ;;  %1797 = vrcp.f32 %v352_v39 }
  0x2c   : > { %1607 = vmatpush3.msra.mxu0 %v366_v31 }
  0x2d   : > { %1608 = vmatprep.subr.mxu0 %v381_v32 }
  0x2e   : > { %1609 = vmatpush3.msra.mxu0 %v365_v33 }
  0x2f   : > { %1610 = vmatprep.subr.mxu0 %v380_v34 }
  0x30   : > { %1611 = vmatpush3.msra.mxu0 %v364_v35 }
  0x31   : > { %1612 = vmatprep.subr.mxu0 %v379_v37 }
  0x32   : > { %1613 = vmatpush3.msra.mxu0 %v363_v38 }
  0x33   : > { %1614 = vmatprep.subr.mxu0 %v378_v40 }
  0x34   : > { %1615 = vmatpush3.msra.mxu0 %v362_v41 }
  0x35   : > { %459 = vmatmul.mubr.f32.vlgmr.msra.gmra.mxu0 %v360_v42  ;;  %1708 = vmatprep.subr.mxu0 %v1877_v4 }
  0x36   : > { %1710 = vmatprep.mubr.msk.f32.mxu0 %vm1878_vm0, %v1877_v4 }
  0x38   : > { %v1798_v43 = vpop.eup %1797 }
  0x39   : > { %v355_v44 = vmul.f32 %v1798_v43, %v2045_v14 }
  0x3b   : > { %1664 = vmatmul.mubr.msk.f32.vlgmr.msra.gmra.mxu1 %vm464_vm1, %v355_v44 }
  0x3c   : > { %1674 = vmatprep.mubr.msk.f32.mxu1 %vm1878_vm0, %v1877_v4  ;;  %1667 = vmatpush3.msra.mxu1 %v541_v45 }
  0x3d   : > { %1668 = vmatprep.subr.mxu1 %v1877_v4 }
  0x3e   : > { %1669 = vmatpush3.msra.mxu1 %v540_v46 }
  0x3f   : > { %1670 = vmatprep.subr.mxu1 %v1877_v4 }
  0x40   : > { %1671 = vmatpush3.msra.mxu1 %v539_v47 }
  0x41   : > { %1672 = vmatprep.subr.mxu1 %v1877_v4 }
  0x42   : > { %1673 = vmatpush3.msra.mxu1 %v538_v48 }
  0x43   : > { %1677 = vmatprep.subr.mxu1 %v1877_v4 }
  0xf5   : > { %v1616_v49 = vpop.f32.mrf.mxu0 }
  0xf7   : > { %v1617_v50 = vpop.f32.mrf.mxu0 }
  0xf8   : > { %v1618_v51 = vadd.f32 %v1617_v50, %v1616_v49 }
  0xfb   : > { %v534_v52 = vpop.f32.mrf.mxu1 }
  0xfc   : > { %v2146_v53 = vadd.f32 %v1618_v51, %v534_v52 }
  0xfd   : > { %v1665_v54 = vpop.f32.mrf.mxu1 }
  0xfe   : > { %625 = vrot.lane.b32.xlu0 %v2146_v53, %s1879_s18  ;;  %1675 = vmatmul.mubr.msk.f32.vlgmr.msra.gmra.mxu1 %vm464_vm1, %v2146_v53  ;;  %v544_v59 = vmul.f32 %v542_v55, %v2146_v53 }
  0xff   : > { %1678 = vmatpush3.msra.mxu1 %v541_v45  ;;  %1685 = vmatprep.mubr.msk.f32.mxu1 %vm1878_vm0, %v1877_v4 }
 0x100   : > { %1679 = vmatprep.subr.mxu1 %v1877_v4 }
 0x101   : > { %1680 = vmatpush3.msra.mxu1 %v540_v46 }
 0x102   : > { %621 = vrot.lane.b32.xlu0 %v542_v55, %s1880_s21  ;;  %1681 = vmatprep.subr.mxu1 %v1877_v4 }
 0x103   : > { %1682 = vmatpush3.msra.mxu1 %v539_v47 }
 0x104   : > { %1683 = vmatprep.subr.mxu1 %v1877_v4 }
 0x105   : > { %1684 = vmatpush3.msra.mxu1 %v538_v48 }
 0x106   : > { %1688 = vmatprep.subr.mxu1 %v1877_v4 }
 0x170   : > { %v626_v56 = vpop.permute.xlu0 %625 }
 0x171   : > { %1686 = vmatmul.mubr.msk.f32.vlgmr.msra.gmra.mxu1 %vm464_vm1, %v626_v56 }
 0x172   : > { %1690 = vmatprep.mubr.msk.f32.mxu1 %vm1878_vm0, %v1877_v4 }
 0x174   : > { %v622_v2 = vpop.permute.xlu0 %621 }
 0x175   : > { %v624_v3 = vmul.f32 %v622_v2, %v2146_v53  ;;  %v1384_v2 = vld [vmem:[%s2286_s7 + $0x8] sm:$0xff] }
 0x1be   : > { %v614_v58 = vpop.f32.mrf.mxu1 }
 0x1bf   : > { %v618_v60 = vmul.f32 %v614_v58, %v543_v57 }
 0x1c0   : > { %v1676_v61 = vpop.f32.mrf.mxu1 }
 0x1c1   : > { %v619_v62 = vadd.f32 %v618_v60, %v544_v59 }
 0x231   : > { %v695_v63 = vpop.f32.mrf.mxu1 }
 0x232   : > { %v699_v0 = vmul.f32 %v695_v63, %v543_v57 }
 0x233   : > { %v1687_v1 = vpop.f32.mrf.mxu1 }
 0x234   : > { %701 = vrot.lane.b32.xlu1 %v699_v0, %s1880_s21  ;;  %v1386_v0 = vld [vmem:[%s2286_s7 + $0x18] sm:$0xff]  ;;  %v1385_v1 = vld [vmem:[%s2286_s7 + $0x10] sm:$0xff]  ;;  %s1580_s21 = sshll.u32 %s1966_s13, 7  ;;  %s1894_s13 = smov [#allocation2]  }
 0x2a6   : > { %v702_v5 = vpop.permute.xlu1 %701 }
 0x2a7   : > { %v704_v6 = vadd.f32 %v702_v5, %v624_v3  ;;  %v1383_v3 = vld [vmem:[%s2286_s7] sm:$0xff] }
 0x2a9   : > { %706 = vrot.lane.b32.xlu1 %v704_v6, %s1879_s18  ;;  %s1889_s18 = smov 56  }
 0x2ad   : > { %873 = vrot.lane.b32.xlu1 %v704_v6, %s1881_s16 }
 0x31b   : > { %v707_v7 = vpop.permute.xlu1 %706 }
 0x31c   : > { %1689 = vmatpush3.xpose.msk.msra.mxu1 %vm708_vm2, %v707_v7 }
 0x31d   : > { %1693 = vmatprep.subr.mxu1 %v1877_v4 }
 0x31f   : > { %1691 = vmatmul.mubr.msk.f32.vlgmr.msra.gmra.mxu1 %vm708_vm2, %v619_v62  ;;  %v874_v17 = vpop.permute.xlu1 %873 }
 0x320   : > { %1695 = vmatprep.mubr.msk.f32.mxu1 %vm1878_vm0, %v1877_v4 }
 0x3df   : > { %v780_v8 = vpop.f32.mrf.mxu1 }
 0x3e0   : > { %v784_v9 = vsel %vm708_vm2, %v780_v8, -inf }
 0x3e1   : > { %785 = vmax.xlane.f32.xlu0 %v784_v9  ;;  %v1692_v10 = vpop.f32.mrf.mxu1 }
 0x3f7   : > { %795 = vrot.lane.b32.xlu0 %v2146_v53, %s1882_s25 }
 0x3fb   : > { %871 = vrot.lane.b32.xlu0 %v619_v62, %s1883_s26  ;;  %s2243_s26 = scalar_lea.hbm %s2288_s9, %s1580_s21 }
 0x3ff   : > { %1036 = vrot.lane.b32.xlu0 %v619_v62, %s1884_s28 }
 0x403   : > { %1201 = vrot.lane.b32.xlu0 %v619_v62, %s1885_s29  ;;  %s1891_s29 = smov 8  }
 0x46a   : > { %v786_v11 = vpop.xlane.xlu0 %785 }
 0x46b   : > { %v787_v12 = vsub.f32 %v780_v8, %v786_v11 }
 0x46d   : > { %v788_v13 = vmul.f32 1.442695, %v787_v12 }
 0x46e   : > { %v796_v14 = vpop.permute.xlu0 %795 }
 0x46f   : > { %1799 = vpow2.f32 %v788_v13  ;;  %1694 = vmatpush3.msra.mxu1 %v796_v14 }
 0x470   : > { %1698 = vmatprep.subr.mxu1 %v1877_v4 }
 0x472   : > { %v872_v18 = vpop.permute.xlu0 %871 }
 0x476   : > { %v1037_v21 = vpop.permute.xlu0 %1036 }
 0x47a   : > { %v1202_v23 = vpop.permute.xlu0 %1201 }
 0x47c   : > { %v1800_v15 = vpop.eup %1799 }
 0x47d   : > { %v790_v16 = vsel %vm708_vm2, %v1800_v15, 0.0 }
 0x47e   : > { %791 = vadd.xlane.f32.xlu1 %v790_v16  ;;  %v1577_v16 = vld [vmem:[%s2287_s8] ss:$0 sm:$0xff] }
 0x48f   : > { %1038 = vrot.lane.b32.xlu1 %v704_v6, %s1886_s14  ;;  %s1892_s14 = smov 16  }
 0x493   : > { %1203 = vrot.lane.b32.xlu1 %v704_v6, %s1887_s17  ;;  %s1893_s17 = smov 24  }
 0x507   : > { %v792_v19 = vpop.xlane.xlu1 %791 }
 0x508   : > { %1801 = vrcp.f32 %v792_v19 }
 0x50b   : > { %v1039_v20 = vpop.permute.xlu1 %1038 }
 0x50c   : > { %1709 = vmatpush3.xpose.msk.msra.mxu0 %vm708_vm2, %v1039_v20 }
 0x50d   : > { %1718 = vmatprep.subr.mxu0 %v1877_v4 }
 0x50f   : > { %v1204_v22 = vpop.permute.xlu1 %1203  ;;  %1711 = vmatmul.mubr.msk.f32.vlgmr.msra.gmra.mxu0 %vm708_vm2, %v1037_v21 }
 0x510   : > { %1719 = vmatpush3.xpose.msk.msra.mxu0 %vm708_vm2, %v1204_v22  ;;  %1720 = vmatprep.mubr.msk.f32.mxu0 %vm1878_vm0, %v1877_v4 }
 0x511   : > { %1728 = vmatprep.subr.mxu0 %v1877_v4 }
 0x513   : > { %1721 = vmatmul.mubr.msk.f32.vlgmr.msra.gmra.mxu0 %vm708_vm2, %v1202_v23 }
 0x514   : > { %1736 = vmatprep.mubr.msk.f32.mxu0 %vm1878_vm0, %v1877_v4  ;;  %1729 = vmatpush3.msra.mxu0 %v1386_v0 }
 0x515   : > { %v1802_v24 = vpop.eup %1801  ;;  %1730 = vmatprep.subr.mxu0 %v1877_v4 }
 0x516   : > { %v794_v25 = vmul.f32 %v1802_v24, %v1800_v15  ;;  %1731 = vmatpush3.msra.mxu0 %v1385_v1 }
 0x517   : > { %1732 = vmatprep.subr.mxu0 %v1877_v4 }
 0x518   : > { %1696 = vmatmul.mubr.msk.f32.vlgmr.msra.gmra.mxu1 %vm708_vm2, %v794_v25  ;;  %1733 = vmatpush3.msra.mxu0 %v1384_v2 }
 0x519   : > { %1699 = vmatpush3.xpose.msk.msra.mxu1 %vm708_vm2, %v874_v17  ;;  %1700 = vmatprep.mubr.msk.f32.mxu1 %vm1878_vm0, %v1877_v4 }
 0x51a   : > { %1703 = vmatprep.subr.mxu1 %v1877_v4  ;;  %1734 = vmatprep.subr.mxu0 %v1877_v4 }
 0x51b   : > { %1735 = vmatpush3.msra.mxu0 %v1383_v3 }
 0x51c   : > { %1701 = vmatmul.mubr.msk.f32.vlgmr.msra.gmra.mxu1 %vm708_vm2, %v872_v18 }
 0x51d   : > { %1705 = vmatprep.mubr.msk.f32.mxu1 %vm1878_vm0, %v1877_v4 }
 0x5cf   : > { %v1110_v26 = vpop.f32.mrf.mxu0 }
 0x5d0   : > { %v1114_v27 = vsel %vm708_vm2, %v1110_v26, -inf }
 0x5d1   : > { %1115 = vmax.xlane.f32.xlu0 %v1114_v27  ;;  %v1712_v28 = vpop.f32.mrf.mxu0 }
 0x5d3   : > { %v1275_v29 = vpop.f32.mrf.mxu0 }
 0x5d4   : > { %v1279_v30 = vsel %vm708_vm2, %v1275_v29, -inf }
 0x5d5   : > { %1280 = vmax.xlane.f32.xlu0 %v1279_v30  ;;  %v1722_v31 = vpop.f32.mrf.mxu0 }
 0x5d8   : > { %v2199_v32 = vpop.f32.mrf.mxu1 }
 0x5da   : > { %v1697_v33 = vpop.f32.mrf.mxu1 }
 0x5dc   : > { %v945_v34 = vpop.f32.mrf.mxu1 }
 0x5dd   : > { %v949_v35 = vsel %vm708_vm2, %v945_v34, -inf }
 0x5de   : > { %950 = vmax.xlane.f32.xlu1 %v949_v35  ;;  %v1702_v36 = vpop.f32.mrf.mxu1 }
 0x65a   : > { %v1116_v37 = vpop.xlane.xlu0 %1115 }
 0x65b   : > { %v1117_v38 = vsub.f32 %v1110_v26, %v1116_v37 }
 0x65d   : > { %v1118_v39 = vmul.f32 1.442695, %v1117_v38 }
 0x65e   : > { %v1281_v40 = vpop.xlane.xlu0 %1280 }
 0x65f   : > { %1803 = vpow2.f32 %v1118_v39  ;;  %v1282_v41 = vsub.f32 %v1275_v29, %v1281_v40 }
 0x661   : > { %v1283_v42 = vmul.f32 1.442695, %v1282_v41 }
 0x663   : > { %1805 = vpow2.f32 %v1283_v42 }
 0x667   : > { %v951_v47 = vpop.xlane.xlu1 %950 }
 0x668   : > { %v952_v48 = vsub.f32 %v945_v34, %v951_v47 }
 0x66a   : > { %v953_v49 = vmul.f32 1.442695, %v952_v48 }
 0x66c   : > { %v1804_v43 = vpop.eup %1803  ;;  %1807 = vpow2.f32 %v953_v49 }
 0x66d   : > { %v1120_v44 = vsel %vm708_vm2, %v1804_v43, 0.0 }
 0x66e   : > { %1121 = vadd.xlane.f32.xlu0 %v1120_v44 }
 0x670   : > { %v1806_v45 = vpop.eup %1805 }
 0x671   : > { %v1285_v46 = vsel %vm708_vm2, %v1806_v45, 0.0 }
 0x672   : > { %1286 = vadd.xlane.f32.xlu1 %v1285_v46 }
 0x679   : > { %v1808_v50 = vpop.eup %1807 }
 0x67a   : > { %v955_v51 = vsel %vm708_vm2, %v1808_v50, 0.0 }
 0x683   : > { %1125 = vrot.lane.b32.xlu1 %v2146_v53, %s1888_s11  ;;  %s336_s11 = sand.u32 1, %s1867_s10  }
 0x684   : > { %960 = vrot.lane.b32.xlu0 %v2146_v53, %s1889_s18  ;;  %s1557_s18 = sshll.u32 %s336_s11, 3  ;;  %s1469_s28 = scalar_lea.sflag [#allocation3], %s336_s11 }
 0x685   : > { %s338_s22 = scalar_lea.vmem [#allocation2], %s1557_s18 }
 0x686   : > { %s1482_s23 = sshll.u32 %s338_s22, 4  ;;  %s1483_s23 = int_to_ptr.vmem [resolvable:$true] %s1482_s23 }
 0x6a7   : > { %956 = vadd.xlane.f32.xlu1 %v955_v51 }
 0x6b8   : > { %1290 = vrot.lane.b32.xlu1 %v2146_v53, %s1890_s24 }
 0x6f7   : > { %v1122_v52 = vpop.xlane.xlu0 %1121 }
 0x6fb   : > { %v961_v54 = vpop.permute.xlu0 %960  ;;  %v1287_v55 = vpop.xlane.xlu1 %1286 }
 0x6fc   : > { %1704 = vmatpush3.msra.mxu1 %v961_v54 }
 0x6fd   : > { %1713 = vmatprep.subr.mxu1 %v1877_v4 }
 0x6ff   : > { %v1126_v56 = vpop.permute.xlu1 %1125 }
 0x730   : > { %v957_v57 = vpop.xlane.xlu1 %956 }
 0x731   : > { %1809 = vrcp.f32 %v957_v57 }
 0x732   : > { %1811 = vrcp.f32 %v1122_v52 }
 0x733   : > { %1813 = vrcp.f32 %v1287_v55 }
 0x734   : > { %v1291_v62 = vpop.permute.xlu1 %1290 }
 0x73e   : > { %v1810_v58 = vpop.eup %1809 }
 0x73f   : > { %v959_v59 = vmul.f32 %v1810_v58, %v1808_v50  ;;  %v1812_v60 = vpop.eup %1811 }
 0x740   : > { %v1124_v53 = vmul.f32 %v1812_v60, %v1804_v43  ;;  %v1814_v61 = vpop.eup %1813 }
 0x741   : > { %1706 = vmatmul.mubr.msk.f32.vlgmr.msra.gmra.mxu1 %vm708_vm2, %v959_v59  ;;  %v1289_v63 = vmul.f32 %v1814_v61, %v1806_v45 }
 0x742   : > { %1714 = vmatpush3.msra.mxu1 %v1126_v56  ;;  %1715 = vmatprep.mubr.msk.f32.mxu1 %vm1878_vm0, %v1877_v4 }
 0x743   : > { %1723 = vmatprep.subr.mxu1 %v1877_v4 }
 0x745   : > { %1716 = vmatmul.mubr.msk.f32.vlgmr.msra.gmra.mxu1 %vm708_vm2, %v1124_v53 }
 0x746   : > { %1724 = vmatpush3.msra.mxu1 %v1291_v62  ;;  %1725 = vmatprep.mubr.msk.f32.mxu1 %vm1878_vm0, %v1877_v4 }
 0x749   : > { %1726 = vmatmul.mubr.msk.f32.vlgmr.msra.gmra.mxu1 %vm708_vm2, %v1289_v63 }
 0x801   : > { %v1032_v5 = vpop.f32.mrf.mxu1 }
 0x802   : > { %1367 = vrot.lane.b32.xlu0 %v1032_v5, %s1891_s29  ;;  %s1815_s29 = scalar_lea.vmem %s1483_s23, 128 }
 0x803   : > { %v1707_v6 = vpop.f32.mrf.mxu1  ;;  %p1816_p11 = scmp.ne.s32.totalorder %s1483_s23, %s1815_s29 }
 0x805   : > { %v1197_v7 = vpop.f32.mrf.mxu1  ;;  %p1817_p12 = pnand %p1816_p11, %p1983_p5 }
 0x806   : > { %1371 = vrot.lane.b32.xlu1 %v1197_v7, %s1892_s14  ;;  %s1819_s14 = sshll.u32 %s1894_s13, 4  ;;  %s1820_s14 = int_to_ptr.vmem [resolvable:$false] %s1819_s14 }
 0x807   : > { %v1717_v8 = vpop.f32.mrf.mxu1  ;;  %p1818_p13 = pneg %p1817_p12  ;;  %p1822_p0 = scmp.lt.s32.totalorder %s1483_s23, %s1820_s14 }
 0x809   : > { %v1362_v9 = vpop.f32.mrf.mxu1 }
 0x80a   : > { %1375 = vrot.lane.b32.xlu0 %v1362_v9, %s1893_s17  ;;  %s1821_s17 = scalar_lea.vmem %s1820_s14, 256 }
 0x80b   : > { %v1727_v10 = vpop.f32.mrf.mxu1  ;;  %p1823_p1 = scmp.lt.s32.totalorder %s1821_s17, %s1815_s29 }
 0x80d   : > { %p1824_p2 = por %p1823_p1, %p1822_p0 }
 0x80f   : > { %p1825_p3 = pnand %p1824_p2, %p1818_p13 }
 0x874   : > { %v1368_v4 = vpop.permute.xlu0 %1367 }
 0x875   : > { %v1378_v12 = vsel %vm708_vm2, %v2199_v32, %v1368_v4 }
 0x878   : > { %v1372_v11 = vpop.permute.xlu1 %1371 }
 0x879   : > { %v1380_v13 = vsel %vm1379_vm3, %v1378_v12, %v1372_v11 }
 0x87c   : > { %v1376_v14 = vpop.permute.xlu0 %1375 }
 0x87d   : > { %v1382_v15 = vsel %vm1381_vm4, %v1380_v13, %v1376_v14 }
 0x87e   : > { %1737 = vmatmul.mubr.msk.f32.vlgmr.msra.gmra.mxu0 %vm464_vm1, %v1382_v15 }
 0x93e   : > { %v1463_v17 = vpop.f32.mrf.mxu0 }
 0x93f   : > { %v1464_v18 = vadd.f32 %v1577_v16, %v1463_v17 }
 0x940   : > { %v1738_v19 = vpop.f32.mrf.mxu0 }
 0x941   : > { %1467 = vst.msk [vmem:[%s338_s22] sm:$0xff] %vm464_vm1, %v1464_v18 }
 0x942   : > { %1828 = shalt.err (!%p1825_p3)
}
 0x943   : > { %s1829_s18 = scalar_lea.hbm %s2243_s26, 128  ;;  %s1833_s27 = scalar_lea.hbm %s2288_s9, 256 }
 0x944   : > { %p1830_p4 = scmp.ne.s32.totalorder %s2243_s26, %s1829_s18  ;;  %p1834_p9 = scmp.lt.s32.totalorder %s2243_s26, %s2288_s9 }
 0x945   : > { %p1835_p10 = scmp.lt.s32.totalorder %s1833_s27, %s1829_s18 }
 0x946   : > { %p1831_p7 = pnand %p1830_p4, %p1983_p5 }
 0x947   : > { %p1836_p11 = por %p1835_p10, %p1834_p9 }
 0x948   : > { %p1832_p8 = pneg %p1831_p7 }
 0x94a   : > { %p1837_p12 = pnand %p1836_p11, %p1832_p8 }
 0x94c   : > { %1840 = shalt.err (!%p1837_p12)
}
 0x94d   : > { %1739 = dma.vmem_to_hbm [thread:$0]  (%p1983_p5), %s1483_s23, 128, %s2243_s26, %s1469_s28  }
 0x94e PF: > { %p1745_p13 = scmp.ge.s32.totalorder %s1875_s12, 2  ;;  %s1494_s16 = sand.u32 1, %s1863_s30  }
 0x94f   : > { %s1495_s25 = scalar_lea.sflag [#allocation3], %s1494_s16 }
 0x950   : > { %p1742_p0 = pnand %p1745_p13, %p1987_p6 }
 0x952   : > { %p1743_p1 = pneg %p1742_p0 }
 0x954   : > { %1858 = dma.done.wait (%p1743_p1), %s1495_s25, 128  }
 0x955   : > { %1860 = vsyncadd (%p1743_p1), %s1495_s25, 4294967168  ;;  %s2294_s29 = sld [smem:[#allocation5_spill]]  ;;  %p19_p2 = scmp.ge.s32.totalorder %s1970_s15, 4  }
 0x956   : > { %s2295_s11 = sld [smem:[#allocation6_spill]]  ;;  %s2296_s30 = smov %s1867_s10 }
 0x957   : > { %s2298_s12 = smov %s1970_s15  ;;  %21 = sbr.rel (!%p19_p2) target bundleno = 3 (0x3), region = 94 }
 0x95b   : > { %s2297_s10 = smov %s2294_s29 }
 0x95c   :  { %1500 = vsyncpa [#allocation3], 1 }
 0x95d   :  { %1502 = vsyncpa [#allocation3 + $0x1], 1 }

</bundles_post_ra>
